<compile_context>
chip_gen: v7x
topology: tpu7x:2x2x1
jax: 0.10.0
libtpu: 0.0.40
codegen_flags: <defaults>
</compile_context>

<pallas_src>
import jax
import jax.numpy as jnp
from jax.experimental import pallas as pl
from jax.experimental.pallas import tpu as pltpu


_BN_EPS = 1e-5
_LANE = 128

_VMEM_SPEC = pl.BlockSpec(memory_space=pltpu.MemorySpace.VMEM)


# --------------------------------------------------------------------------
# Fused single-block kernel (small batch: whole batch in one VMEM block)
# --------------------------------------------------------------------------
def _make_fused_mlp_kernel(num_hidden):
    """Kernel ref order: [x, (w, gamma, beta) * num_hidden, w_last, b_last, o]."""

    def kernel(*refs):
        x_ref = refs[0]
        o_ref = refs[-1]

        h = x_ref[...]                                        # (N, Fin), f32
        idx = 1
        for _ in range(num_hidden):
            w = refs[idx][...]                                # (Fin, Fout_pad)
            g = refs[idx + 1][...]                            # (1, Fout_pad)
            beta = refs[idx + 2][...]                         # (1, Fout_pad)
            idx += 3

            # Linear (no bias: BN mean-subtraction cancels it exactly).
            y = jnp.dot(h, w, preferred_element_type=jnp.float32)

            # BatchNorm1d (training mode): batch mean, biased variance,
            # two-pass (y - mean) form for numerical safety, folded into a
            # single per-feature scale/shift.
            mean = jnp.mean(y, axis=0, keepdims=True)
            diff = y - mean
            var = jnp.mean(diff * diff, axis=0, keepdims=True)
            scale = g * jax.lax.rsqrt(var + _BN_EPS)          # (1, F)
            shift = beta - mean * scale                       # (1, F)

            # ReLU
            h = jnp.maximum(y * scale + shift, 0.0)

        # Final Linear (lane-dense padded output slab) + bias.
        w = refs[idx][...]
        b = refs[idx + 1][...]
        o_ref[...] = jnp.dot(h, w, preferred_element_type=jnp.float32) + b

    return kernel


def _fused_forward(x, params):
    n = x.shape[0]
    num_hidden = len(params) - 1

    flat_inputs = [x]
    flops = 0
    transcendentals = 0
    bytes_accessed = x.size * 4
    for (w, g, beta) in params[:-1]:
        flat_inputs += [w, g, beta]
        flops += 2 * n * w.shape[0] * w.shape[1] + 8 * n * w.shape[1]
        transcendentals += w.shape[1]                         # one rsqrt / feature
        bytes_accessed += (w.size + g.size + beta.size) * 4
    w_last, b_last = params[-1]
    flat_inputs += [w_last, b_last]
    flops += 2 * n * w_last.shape[0] * w_last.shape[1]
    bytes_accessed += (w_last.size + b_last.size) * 4 + n * w_last.shape[1] * 4

    return pl.pallas_call(
        _make_fused_mlp_kernel(num_hidden),
        out_shape=jax.ShapeDtypeStruct((n, w_last.shape[1]), jnp.float32),
        in_specs=[_VMEM_SPEC] * len(flat_inputs),
        out_specs=_VMEM_SPEC,
        cost_estimate=pl.CostEstimate(
            flops=flops,
            transcendentals=transcendentals,
            bytes_accessed=bytes_accessed,
        ),
    )(*flat_inputs)


# --------------------------------------------------------------------------
# Batch-tiled path (large batch): one pipelined pallas_call per layer,
# full-batch BN via per-feature sum / sum-of-squares accumulators.
# --------------------------------------------------------------------------
def _mm_stats_kernel(h_ref, w_ref, y_ref, s1_ref, s2_ref):
    """First layer: y = h @ W, plus per-feature sum and sum-of-squares."""
    y = jnp.dot(h_ref[...], w_ref[...], preferred_element_type=jnp.float32)
    y_ref[...] = y

    @pl.when(pl.program_id(0) == 0)
    def _():
        s1_ref[...] = jnp.zeros_like(s1_ref)
        s2_ref[...] = jnp.zeros_like(s2_ref)

    s1_ref[...] += jnp.sum(y, axis=0, keepdims=True)
    s2_ref[...] += jnp.sum(y * y, axis=0, keepdims=True)


def _make_bn_mm_kernel(inv_n, emit_stats, has_bias):
    """BN(prev layer stats) -> ReLU -> matmul with this layer's weight.

    Ref order: y, sum, sumsq, gamma, beta, w, [bias], out, [out_sum, out_sumsq]
    """

    def kernel(*refs):
        y_ref, s1_ref, s2_ref, g_ref, beta_ref, w_ref = refs[:6]
        idx = 6
        if has_bias:
            bias_ref = refs[idx]
            idx += 1
        o_ref = refs[idx]
        idx += 1

        mean = s1_ref[...] * inv_n                            # (1, F_in)
        var = jnp.maximum(s2_ref[...] * inv_n - mean * mean, 0.0)
        scale = g_ref[...] * jax.lax.rsqrt(var + _BN_EPS)
        shift = beta_ref[...] - mean * scale
        h = jnp.maximum(y_ref[...] * scale + shift, 0.0)      # BN + ReLU

        o = jnp.dot(h, w_ref[...], preferred_element_type=jnp.float32)
        if has_bias:
            o = o + bias_ref[...]
        o_ref[...] = o

        if emit_stats:
            os1_ref = refs[idx]
            os2_ref = refs[idx + 1]

            @pl.when(pl.program_id(0) == 0)
            def _():
                os1_ref[...] = jnp.zeros_like(os1_ref)
                os2_ref[...] = jnp.zeros_like(os2_ref)

            os1_ref[...] += jnp.sum(o, axis=0, keepdims=True)
            os2_ref[...] += jnp.sum(o * o, axis=0, keepdims=True)

    return kernel


def _tiled_forward(x, params, tm):
    n = x.shape[0]
    n_tiles = n // tm
    inv_n = 1.0 / n
    num_hidden = len(params) - 1

    # Stats accumulators are grid-resident outputs -> axis must be 'arbitrary'.
    # vmem_limit sized conservatively so the same tiling fits v7x (64 MiB
    # physical) as well as v5e/v6e.
    arb = pltpu.CompilerParams(
        dimension_semantics=("arbitrary",),
        vmem_limit_bytes=32 * 1024 * 1024,
    )

    # Layer 0: x @ W0  (+ full-batch per-feature sum / sumsq).
    w0, g_prev, beta_prev = params[0]
    fin0, f0 = w0.shape
    y, s1, s2 = pl.pallas_call(
        _mm_stats_kernel,
        out_shape=(
            jax.ShapeDtypeStruct((n, f0), jnp.float32),
            jax.ShapeDtypeStruct((1, f0), jnp.float32),
            jax.ShapeDtypeStruct((1, f0), jnp.float32),
        ),
        grid=(n_tiles,),
        in_specs=[
            pl.BlockSpec((tm, fin0), lambda i: (i, 0)),
            pl.BlockSpec((fin0, f0), lambda i: (0, 0)),
        ],
        out_specs=(
            pl.BlockSpec((tm, f0), lambda i: (i, 0)),
            pl.BlockSpec((1, f0), lambda i: (0, 0)),
            pl.BlockSpec((1, f0), lambda i: (0, 0)),
        ),
        compiler_params=arb,
    )(x, w0)

    # Hidden layers 1..H-1: BN(prev stats) -> ReLU -> matmul (+ new stats).
    for l in range(1, num_hidden):
        w, g, beta = params[l]
        fin, fout = w.shape
        y, s1, s2 = pl.pallas_call(
            _make_bn_mm_kernel(inv_n, emit_stats=True, has_bias=False),
            out_shape=(
                jax.ShapeDtypeStruct((n, fout), jnp.float32),
                jax.ShapeDtypeStruct((1, fout), jnp.float32),
                jax.ShapeDtypeStruct((1, fout), jnp.float32),
            ),
            grid=(n_tiles,),
            in_specs=[
                pl.BlockSpec((tm, fin), lambda i: (i, 0)),
                pl.BlockSpec((1, fin), lambda i: (0, 0)),
                pl.BlockSpec((1, fin), lambda i: (0, 0)),
                pl.BlockSpec((1, fin), lambda i: (0, 0)),
                pl.BlockSpec((1, fin), lambda i: (0, 0)),
                pl.BlockSpec((fin, fout), lambda i: (0, 0)),
            ],
            out_specs=(
                pl.BlockSpec((tm, fout), lambda i: (i, 0)),
                pl.BlockSpec((1, fout), lambda i: (0, 0)),
                pl.BlockSpec((1, fout), lambda i: (0, 0)),
            ),
            compiler_params=arb,
        )(y, s1, s2, g_prev, beta_prev, w)
        g_prev, beta_prev = g, beta

    # Final layer: BN(prev stats) -> ReLU -> matmul + bias.  No cross-tile
    # state, so the row-tile axis is genuinely parallel (megacore-friendly).
    w_last, bias_last = params[-1]
    fin, fout = w_last.shape
    out = pl.pallas_call(
        _make_bn_mm_kernel(inv_n, emit_stats=False, has_bias=True),
        out_shape=jax.ShapeDtypeStruct((n, fout), jnp.float32),
        grid=(n_tiles,),
        in_specs=[
            pl.BlockSpec((tm, fin), lambda i: (i, 0)),
            pl.BlockSpec((1, fin), lambda i: (0, 0)),
            pl.BlockSpec((1, fin), lambda i: (0, 0)),
            pl.BlockSpec((1, fin), lambda i: (0, 0)),
            pl.BlockSpec((1, fin), lambda i: (0, 0)),
            pl.BlockSpec((fin, fout), lambda i: (0, 0)),
            pl.BlockSpec((1, fout), lambda i: (0, 0)),
        ],
        out_specs=pl.BlockSpec((tm, fout), lambda i: (i, 0)),
        compiler_params=pltpu.CompilerParams(
            dimension_semantics=("parallel",),
            vmem_limit_bytes=32 * 1024 * 1024,
        ),
    )(y, s1, s2, g_prev, beta_prev, w_last, bias_last)
    return out


# --------------------------------------------------------------------------
# Public forward
# --------------------------------------------------------------------------
def mlp_forward(x, params, out_features, *, row_tile=512, fused_max_rows=256):
    """params (pre-padded, from init_mlp_params):
       hidden layers: (W (Fin, Fout_pad), gamma (1, Fout_pad), beta (1, Fout_pad))
       final layer  : (W (Fin_pad, Fout_pad), bias (1, Fout_pad))
    """
    n = x.shape[0]
    if n <= fused_max_rows or (n % row_tile) != 0:
        out_padded = _fused_forward(x, params)
    else:
        out_padded = _tiled_forward(x, params, row_tile)
    return out_padded[:, :out_features]


# --------------------------------------------------------------------------
# Parameter init (PyTorch-style), pre-transposed + pre-padded (lane-dense)
# --------------------------------------------------------------------------
def _round_up(v, m):
    return ((v + m - 1) // m) * m


def init_mlp_params(key, layer_sizes):
    """W, b ~ U(-1/sqrt(fan_in), 1/sqrt(fan_in)) (fan_in = true in_features).
    Weights stored as (F_in, F_out) and zero-padded to 128-lane widths; hidden
    biases are dropped (BatchNorm's mean-subtraction cancels them exactly);
    BN gamma=1 / beta=0 on the real features, 0 on the padded lanes."""
    params = []
    n_layers = len(layer_sizes)
    fin_container = layer_sizes[0][0]     # first layer keeps the true fan-in
    for i, (fin, fout) in enumerate(layer_sizes):
        fout_pad = _round_up(fout, _LANE)
        key, kw, kb = jax.random.split(key, 3)
        bound = 1.0 / float(fin) ** 0.5
        w = jax.random.uniform(kw, (fin, fout), jnp.float32, -bound, bound)
        w_pad = jnp.zeros((fin_container, fout_pad), jnp.float32)
        w_pad = w_pad.at[:fin, :fout].set(w)
        if i < n_layers - 1:
            gamma = jnp.zeros((1, fout_pad), jnp.float32).at[:, :fout].set(1.0)
            beta = jnp.zeros((1, fout_pad), jnp.float32)
            params.append((w_pad, gamma, beta))
        else:
            b = jax.random.uniform(kb, (1, fout), jnp.float32, -bound, bound)
            b_pad = jnp.zeros((1, fout_pad), jnp.float32).at[:, :fout].set(b)
            params.append((w_pad, b_pad))
        fin_container = fout_pad
    return params


# --------------------------------------------------------------------------
# Pure-JAX reference (same padded params, same training-mode BN semantics)
# --------------------------------------------------------------------------
def mlp_reference(x, params, out_features):
    h = x
    for (w, g, beta) in params[:-1]:
        y = jnp.dot(h, w, precision=jax.lax.Precision.HIGHEST)
        mean = jnp.mean(y, axis=0, keepdims=True)
        var = jnp.mean((y - mean) ** 2, axis=0, keepdims=True)
        h = jnp.maximum((y - mean) * jax.lax.rsqrt(var + _BN_EPS) * g + beta, 0.0)
    w, b = params[-1]
    out = jnp.dot(h, w, precision=jax.lax.Precision.HIGHEST) + b
    return out[:, :out_features]


# --------------------------------------------------------------------------
# Main
# --------------------------------------------------------------------------
if __name__ == "__main__":
    # layer_sizes as the PyTorch module expects: (in_features, out_features)
    layer_sizes = [(16, 32), (32, 32), (32, 8)]
    out_features = layer_sizes[-1][1]

    key = jax.random.PRNGKey(0)
    key, kx = jax.random.split(key)
    params = init_mlp_params(key, layer_sizes)

    fwd = jax.jit(
        mlp_forward, static_argnames=("out_features", "row_tile", "fused_max_rows")
    )

    # Small batch -> fused single-kernel path.
    x_small = jax.random.normal(kx, (8, layer_sizes[0][0]), dtype=jnp.float32)
    out_small = jax.block_until_ready(fwd(x_small, params, out_features=out_features))
    ref_small = mlp_reference(x_small, params, out_features)
    assert out_small.shape == (8, out_features)
    assert bool(jnp.all(jnp.isfinite(out_small)))
    assert bool(jnp.allclose(out_small, ref_small, rtol=3e-2, atol=3e-2))

    # Larger (still small) batch -> batch-tiled, pipelined per-layer path
    # with full-batch BatchNorm statistics.
    key, kx2 = jax.random.split(key)
    x_big = jax.random.normal(kx2, (512, layer_sizes[0][0]), dtype=jnp.float32)
    out_big = jax.block_until_ready(
        fwd(x_big, params, out_features=out_features, row_tile=128)
    )
    ref_big = mlp_reference(x_big, params, out_features)
    assert out_big.shape == (512, out_features)
    assert bool(jnp.all(jnp.isfinite(out_big)))
    assert bool(jnp.allclose(out_big, ref_big, rtol=3e-2, atol=3e-2))

    print("KERNEL_OK")
</pallas_src>

<mosaic_0001>
module attributes {stable_mosaic.version = 11 : i64} {
  func.func @kernel(%arg0: memref<8x16xf32, #tpu.memory_space<vmem>>, %arg1: memref<16x128xf32, #tpu.memory_space<vmem>>, %arg2: memref<1x128xf32, #tpu.memory_space<vmem>>, %arg3: memref<1x128xf32, #tpu.memory_space<vmem>>, %arg4: memref<128x128xf32, #tpu.memory_space<vmem>>, %arg5: memref<1x128xf32, #tpu.memory_space<vmem>>, %arg6: memref<1x128xf32, #tpu.memory_space<vmem>>, %arg7: memref<128x128xf32, #tpu.memory_space<vmem>>, %arg8: memref<1x128xf32, #tpu.memory_space<vmem>>, %arg9: memref<8x128xf32, #tpu.memory_space<vmem>>) attributes {dimension_semantics = [], scalar_prefetch = 0 : i64, scratch_operands = 0 : i64, tpu.core_type = #tpu.core_type<tc>} {
    %c0 = arith.constant 0 : index
    %c0_0 = arith.constant 0 : index
    %0 = vector.load %arg0[%c0, %c0_0] : memref<8x16xf32, #tpu.memory_space<vmem>>, vector<8x16xf32>
    %c0_1 = arith.constant 0 : index
    %c0_2 = arith.constant 0 : index
    %1 = vector.load %arg1[%c0_1, %c0_2] : memref<16x128xf32, #tpu.memory_space<vmem>>, vector<16x128xf32>
    %c0_3 = arith.constant 0 : index
    %c0_4 = arith.constant 0 : index
    %2 = vector.load %arg2[%c0_3, %c0_4] : memref<1x128xf32, #tpu.memory_space<vmem>>, vector<1x128xf32>
    %c0_5 = arith.constant 0 : index
    %c0_6 = arith.constant 0 : index
    %3 = vector.load %arg3[%c0_5, %c0_6] : memref<1x128xf32, #tpu.memory_space<vmem>>, vector<1x128xf32>
    %cst = arith.constant dense<0.000000e+00> : vector<8x128xf32>
    %4 = tpu.matmul %0, %1, %cst {dimension_numbers = #tpu.dot_dimension_numbers<[1], [0], [0], [1], [0, 0, 1, 1], [], []>} : vector<8x16xf32>, vector<16x128xf32>, vector<8x128xf32> -> vector<8x128xf32>
    %cst_7 = arith.constant dense<0.000000e+00> : vector<128xf32>
    %5 = vector.multi_reduction <add>, %4, %cst_7 [0] : vector<8x128xf32> to vector<128xf32>
    %6 = vector.shape_cast %5 : vector<128xf32> to vector<1x128xf32>
    %cst_8 = arith.constant 8.000000e+00 : f32
    %7 = vector.broadcast %cst_8 : f32 to vector<1x128xf32>
    %8 = arith.divf %6, %7 : vector<1x128xf32>
    %9 = vector.broadcast %8 : vector<1x128xf32> to vector<8x128xf32>
    %10 = arith.subf %4, %9 : vector<8x128xf32>
    %11 = arith.mulf %10, %10 : vector<8x128xf32>
    %cst_9 = arith.constant dense<0.000000e+00> : vector<128xf32>
    %12 = vector.multi_reduction <add>, %11, %cst_9 [0] : vector<8x128xf32> to vector<128xf32>
    %13 = vector.shape_cast %12 : vector<128xf32> to vector<1x128xf32>
    %cst_10 = arith.constant 8.000000e+00 : f32
    %14 = vector.broadcast %cst_10 : f32 to vector<1x128xf32>
    %15 = arith.divf %13, %14 : vector<1x128xf32>
    %cst_11 = arith.constant 9.99999974E-6 : f32
    %16 = vector.broadcast %cst_11 : f32 to vector<1x128xf32>
    %17 = arith.addf %15, %16 : vector<1x128xf32>
    %18 = math.rsqrt %17 : vector<1x128xf32>
    %19 = arith.mulf %2, %18 : vector<1x128xf32>
    %20 = arith.mulf %8, %19 : vector<1x128xf32>
    %21 = arith.subf %3, %20 : vector<1x128xf32>
    %22 = vector.broadcast %19 : vector<1x128xf32> to vector<8x128xf32>
    %23 = arith.mulf %4, %22 : vector<8x128xf32>
    %24 = vector.broadcast %21 : vector<1x128xf32> to vector<8x128xf32>
    %25 = arith.addf %23, %24 : vector<8x128xf32>
    %cst_12 = arith.constant 0.000000e+00 : f32
    %26 = vector.broadcast %cst_12 : f32 to vector<8x128xf32>
    %27 = arith.maximumf %25, %26 : vector<8x128xf32>
    %c0_13 = arith.constant 0 : index
    %c0_14 = arith.constant 0 : index
    %28 = vector.load %arg4[%c0_13, %c0_14] : memref<128x128xf32, #tpu.memory_space<vmem>>, vector<128x128xf32>
    %c0_15 = arith.constant 0 : index
    %c0_16 = arith.constant 0 : index
    %29 = vector.load %arg5[%c0_15, %c0_16] : memref<1x128xf32, #tpu.memory_space<vmem>>, vector<1x128xf32>
    %c0_17 = arith.constant 0 : index
    %c0_18 = arith.constant 0 : index
    %30 = vector.load %arg6[%c0_17, %c0_18] : memref<1x128xf32, #tpu.memory_space<vmem>>, vector<1x128xf32>
    %cst_19 = arith.constant dense<0.000000e+00> : vector<8x128xf32>
    %31 = tpu.matmul %27, %28, %cst_19 {dimension_numbers = #tpu.dot_dimension_numbers<[1], [0], [0], [1], [0, 0, 1, 1], [], []>} : vector<8x128xf32>, vector<128x128xf32>, vector<8x128xf32> -> vector<8x128xf32>
    %cst_20 = arith.constant dense<0.000000e+00> : vector<128xf32>
    %32 = vector.multi_reduction <add>, %31, %cst_20 [0] : vector<8x128xf32> to vector<128xf32>
    %33 = vector.shape_cast %32 : vector<128xf32> to vector<1x128xf32>
    %cst_21 = arith.constant 8.000000e+00 : f32
    %34 = vector.broadcast %cst_21 : f32 to vector<1x128xf32>
    %35 = arith.divf %33, %34 : vector<1x128xf32>
    %36 = vector.broadcast %35 : vector<1x128xf32> to vector<8x128xf32>
    %37 = arith.subf %31, %36 : vector<8x128xf32>
    %38 = arith.mulf %37, %37 : vector<8x128xf32>
    %cst_22 = arith.constant dense<0.000000e+00> : vector<128xf32>
    %39 = vector.multi_reduction <add>, %38, %cst_22 [0] : vector<8x128xf32> to vector<128xf32>
    %40 = vector.shape_cast %39 : vector<128xf32> to vector<1x128xf32>
    %cst_23 = arith.constant 8.000000e+00 : f32
    %41 = vector.broadcast %cst_23 : f32 to vector<1x128xf32>
    %42 = arith.divf %40, %41 : vector<1x128xf32>
    %cst_24 = arith.constant 9.99999974E-6 : f32
    %43 = vector.broadcast %cst_24 : f32 to vector<1x128xf32>
    %44 = arith.addf %42, %43 : vector<1x128xf32>
    %45 = math.rsqrt %44 : vector<1x128xf32>
    %46 = arith.mulf %29, %45 : vector<1x128xf32>
    %47 = arith.mulf %35, %46 : vector<1x128xf32>
    %48 = arith.subf %30, %47 : vector<1x128xf32>
    %49 = vector.broadcast %46 : vector<1x128xf32> to vector<8x128xf32>
    %50 = arith.mulf %31, %49 : vector<8x128xf32>
    %51 = vector.broadcast %48 : vector<1x128xf32> to vector<8x128xf32>
    %52 = arith.addf %50, %51 : vector<8x128xf32>
    %cst_25 = arith.constant 0.000000e+00 : f32
    %53 = vector.broadcast %cst_25 : f32 to vector<8x128xf32>
    %54 = arith.maximumf %52, %53 : vector<8x128xf32>
    %c0_26 = arith.constant 0 : index
    %c0_27 = arith.constant 0 : index
    %55 = vector.load %arg7[%c0_26, %c0_27] : memref<128x128xf32, #tpu.memory_space<vmem>>, vector<128x128xf32>
    %c0_28 = arith.constant 0 : index
    %c0_29 = arith.constant 0 : index
    %56 = vector.load %arg8[%c0_28, %c0_29] : memref<1x128xf32, #tpu.memory_space<vmem>>, vector<1x128xf32>
    %cst_30 = arith.constant dense<0.000000e+00> : vector<8x128xf32>
    %57 = tpu.matmul %54, %55, %cst_30 {dimension_numbers = #tpu.dot_dimension_numbers<[1], [0], [0], [1], [0, 0, 1, 1], [], []>} : vector<8x128xf32>, vector<128x128xf32>, vector<8x128xf32> -> vector<8x128xf32>
    %58 = vector.broadcast %56 : vector<1x128xf32> to vector<8x128xf32>
    %59 = arith.addf %57, %58 : vector<8x128xf32>
    %c0_31 = arith.constant 0 : index
    %c0_32 = arith.constant 0 : index
    %60 = vector.load %arg9[%c0_31, %c0_32] : memref<8x128xf32, #tpu.memory_space<vmem>>, vector<8x128xf32>
    tpu.vector_store %arg9[%c0_31, %c0_32], %59 {strides = array<i32>} : memref<8x128xf32, #tpu.memory_space<vmem>>, vector<8x128xf32>,
    return
  }
}

</mosaic_0001>

<bundles_post_ra>
// kernel: mlp_forward.1
= control target key start
LH: loop header
LB: loop body
LE: loop exit
PB: predicated region body
PF: predicated region fallthrough
CT: control target
= control target key end

     0   :  { %14 = vsyncpa [#allocation3], 0  ;;  %s903_s0 = inlined_call_operand.hbm [shape: f32[8,16], index: 0, kind: input, shape index: {}]   ;;  %s904_s1 = inlined_call_operand.hbm [shape: f32[16,128], index: 1, kind: input, shape index: {}]   ;;  %s905_s2 = inlined_call_operand.vmem [shape: f32[1,128], index: 2, kind: input, shape index: {}]   ;;  %s906_s3 = inlined_call_operand.vmem [shape: f32[1,128], index: 3, kind: input, shape index: {}]   ;;  %s907_s4 = inlined_call_operand.hbm [shape: f32[128,128], index: 4, kind: input, shape index: {}]   ;;  %s908_s5 = inlined_call_operand.vmem [shape: f32[1,128], index: 5, kind: input, shape index: {}]   ;;  %s909_s6 = inlined_call_operand.vmem [shape: f32[1,128], index: 6, kind: input, shape index: {}]   ;;  %s910_s7 = inlined_call_operand.hbm [shape: f32[128,128], index: 7, kind: input, shape index: {}]   ;;  %s911_s8 = inlined_call_operand.vmem [shape: f32[1,128], index: 8, kind: input, shape index: {}]   ;;  %s912_s9 = inlined_call_operand.hbm [shape: f32[8,128], index: 9, kind: output, shape index: {}]  }
   0x1   :  { %15 = vsyncpa [#allocation6], 0 }
   0x2   :  { %16 = vsyncpa [#allocation9], 0 }
   0x3   :  { %17 = vsyncpa [#allocation4], 0  ;;  %s736_s30 = smov [#allocation5]   ;;  %s618_s13 = scalar_lea.hbm %s904_s1, 256 }
   0x4   :  { %s33_s10 = sshll.u32 %s736_s30, 4  ;;  %p619_p0 = scmp.ne.s32.totalorder %s904_s1, %s618_s13  ;;  %s34_s10 = int_to_ptr.vmem [resolvable:$true] %s33_s10 }
   0x5   :  { %p622_p1 = scmp.lt.u32.totalorder %s618_s13, %s904_s1 }
   0x7   :  { %p624_p2 = pnand %p622_p1, %p619_p0 }
   0x9   :  { %627 = shalt.err (!%p624_p2)
}
   0xa   :  { %s628_s18 = scalar_lea.vmem %s34_s10, 256  ;;  %p633_p4 = scmp.lt.s32.totalorder %s34_s10, %s34_s10 }
   0xb   :  { %p629_p3 = scmp.ne.s32.totalorder %s34_s10, %s628_s18  ;;  %p634_p5 = scmp.lt.s32.totalorder %s628_s18, %s628_s18 }
   0xd   :  { %p635_p6 = por %p634_p5, %p633_p4 }
   0xf   :  { %p636_p7 = pnand %p635_p6, %p629_p3 }
  0x11   :  { %639 = shalt.err (!%p636_p7)
}
  0x12   :  { %s737_s19 = smov 128   ;;  %s738_s20 = smov 8  }
  0x13   :  { %39 = dma.hbm_to_vmem [thread:$0]  %s904_s1, 256, %s34_s10, [#allocation6], %s737_s19, %s737_s19, %s738_s20  }
  0x14   :  { %s739_s23 = smov [#allocation2]   ;;  %s740_s25 = smov [#allocation7]  }
  0x15   :  { %s24_s24 = sshll.u32 %s739_s23, 4  ;;  %s49_s26 = sshll.u32 %s740_s25, 4  ;;  %s25_s24 = int_to_ptr.vmem [resolvable:$true] %s24_s24  ;;  %s50_s26 = int_to_ptr.vmem [resolvable:$true] %s49_s26 }
  0x16   :  { %s640_s29 = scalar_lea.hbm %s903_s0, 128 }
  0x17   :  { %p641_p8 = scmp.ne.s32.totalorder %s903_s0, %s640_s29  ;;  %p644_p9 = scmp.lt.u32.totalorder %s640_s29, %s903_s0 }
  0x19   :  { %p646_p10 = pnand %p644_p9, %p641_p8 }
  0x1b   :  { %649 = shalt.err (!%p646_p10)
}
  0x1c   :  { %s650_s1 = scalar_lea.vmem %s25_s24, 128  ;;  %p655_p12 = scmp.lt.s32.totalorder %s25_s24, %s25_s24 }
  0x1d   :  { %p651_p11 = scmp.ne.s32.totalorder %s25_s24, %s650_s1  ;;  %p656_p13 = scmp.lt.s32.totalorder %s650_s1, %s650_s1 }
  0x1f   :  { %p657_p0 = por %p656_p13, %p655_p12 }
  0x21   :  { %p658_p1 = pnand %p657_p0, %p651_p11 }
  0x23   :  { %661 = shalt.err (!%p658_p1)
}
  0x24   :  { %27 = dma.hbm_to_vmem [thread:$0]  %s903_s0, 128, %s25_s24, [#allocation3]  }
  0x25   :  { %s662_s17 = scalar_lea.hbm %s907_s4, 2048 }
  0x26   :  { %p663_p2 = scmp.ne.s32.totalorder %s907_s4, %s662_s17  ;;  %p666_p3 = scmp.lt.u32.totalorder %s662_s17, %s907_s4 }
  0x28   :  { %p668_p4 = pnand %p666_p3, %p663_p2 }
  0x2a   :  { %671 = shalt.err (!%p668_p4)
}
  0x2b   :  { %s672_s25 = scalar_lea.vmem %s50_s26, 2048  ;;  %p677_p6 = scmp.lt.s32.totalorder %s50_s26, %s50_s26 }
  0x2c   :  { %p673_p5 = scmp.ne.s32.totalorder %s50_s26, %s672_s25  ;;  %p678_p7 = scmp.lt.s32.totalorder %s672_s25, %s672_s25 }
  0x2e   :  { %p679_p8 = por %p678_p7, %p677_p6 }
  0x30   :  { %p680_p9 = pnand %p679_p8, %p673_p5 }
  0x32   :  { %683 = shalt.err (!%p680_p9)
}
  0x33   :  { %55 = dma.hbm_to_vmem [thread:$0]  %s907_s4, 2048, %s50_s26, [#allocation6], %s737_s19, %s737_s19, %s738_s20  }
  0x34   :  { %s741_s27 = smov [#allocation8]   ;;  %s684_s11 = scalar_lea.hbm %s910_s7, 2048 }
  0x35   :  { %s65_s28 = sshll.u32 %s741_s27, 4  ;;  %p685_p10 = scmp.ne.s32.totalorder %s910_s7, %s684_s11  ;;  %s66_s28 = int_to_ptr.vmem [resolvable:$true] %s65_s28 }
  0x36   :  { %p688_p11 = scmp.lt.u32.totalorder %s684_s11, %s910_s7 }
  0x38   :  { %p690_p12 = pnand %p688_p11, %p685_p10 }
  0x3a   :  { %693 = shalt.err (!%p690_p12)
}
  0x3b   :  { %s694_s14 = scalar_lea.vmem %s66_s28, 2048  ;;  %p699_p0 = scmp.lt.s32.totalorder %s66_s28, %s66_s28 }
  0x3c   :  { %p695_p13 = scmp.ne.s32.totalorder %s66_s28, %s694_s14  ;;  %p700_p1 = scmp.lt.s32.totalorder %s694_s14, %s694_s14 }
  0x3e   :  { %p701_p2 = por %p700_p1, %p699_p0 }
  0x40   :  { %p702_p3 = pnand %p701_p2, %p695_p13 }
  0x42   :  { %705 = shalt.err (!%p702_p3)
}
  0x43   :  { %71 = dma.hbm_to_vmem [thread:$0]  %s910_s7, 2048, %s66_s28, [#allocation9], %s737_s19, %s737_s19, %s738_s20  }
  0x44   :  { %728 = dma.done.wait [#allocation3], 128  }
  0x45   :  { %729 = vsyncadd [#allocation3], 4294967168 }
  0x46   :  { %730 = dma.done.wait [#allocation6], 2304  }
  0x47   :  { %731 = vsyncadd [#allocation6], 4294964992 }
  0x48   :  { %732 = dma.done.wait [#allocation9], 2048  }
  0x49   :  { %733 = vsyncadd [#allocation9], 4294965248  ;;  %v742_v0 = vmov 0.0|0.0   ;;  %vm743_vm0 = vmmov 0   ;;  %v744_v1 = vmov 0.0   ;;  %v87_v2 = vld [vmem:[#allocation5] sm:$0xff]  ;;  %v188_v49 = vlaneseq }
  0x4a   :  { %553 = vmatprep.subr.bf16.mxu0 %v742_v0  ;;  %480 = vmatprep.mubr.msk.f32.mxu0 %vm743_vm0, %v744_v1  ;;  %v88_v3 = vld [vmem:[#allocation5 + $0x8] sm:$0xff]  ;;  %v86_v5 = vld [vmem:[#allocation2] sm:$0xff]  ;;  %vm91_vm1 = vcmask 130048   ;;  %v202_v6 = vld [vmem:[#allocation7] sm:$0xff] }
  0x4b   :  { %556 = vmatprep.subr.bf16.mxu1 %v742_v0  ;;  %515 = vmatprep.mubr.msk.f32.mxu1 %vm743_vm0, %v744_v1  ;;  %v554_v4 = vpack.c.bf16 %v88_v3, %v87_v2  ;;  %v203_v7 = vld [vmem:[#allocation7 + $0x8] sm:$0xff]  ;;  %v204_v9 = vld [vmem:[#allocation7 + $0x10] sm:$0xff]  ;;  %v205_v10 = vld [vmem:[#allocation7 + $0x18] sm:$0xff]  ;;  %v189_v50 = vshrl.u32 %v188_v49, 7 }
  0x4c   :  { %v557_v8 = vpack.c.bf16 %v203_v7, %v202_v6  ;;  %v560_v11 = vpack.c.bf16 %v205_v10, %v204_v9  ;;  %v206_v12 = vld [vmem:[#allocation7 + $0x20] sm:$0xff]  ;;  %v207_v13 = vld [vmem:[#allocation7 + $0x28] sm:$0xff]  ;;  %v208_v15 = vld [vmem:[#allocation7 + $0x30] sm:$0xff] }
  0x4d   :  { %555 = vmatpush3.bf16.msra.mxu0 %v554_v4  ;;  %v563_v14 = vpack.c.bf16 %v207_v13, %v206_v12  ;;  %v209_v16 = vld [vmem:[#allocation7 + $0x38] sm:$0xff]  ;;  %v210_v18 = vld [vmem:[#allocation7 + $0x40] sm:$0xff]  ;;  %v211_v19 = vld [vmem:[#allocation7 + $0x48] sm:$0xff]  ;;  %v866_v52 = vsub.s32 0, %v189_v50 }
  0x4e   :  { %580 = vmatprep.subr.bf16.mxu0 %v742_v0  ;;  %558 = vmatpush3.bf16.msra.mxu1 %v557_v8  ;;  %v566_v17 = vpack.c.bf16 %v209_v16, %v208_v15  ;;  %v569_v20 = vpack.c.bf16 %v211_v19, %v210_v18  ;;  %v212_v21 = vld [vmem:[#allocation7 + $0x50] sm:$0xff]  ;;  %v213_v22 = vld [vmem:[#allocation7 + $0x58] sm:$0xff]  ;;  %v214_v24 = vld [vmem:[#allocation7 + $0x60] sm:$0xff] }
  0x4f   :  { %559 = vmatprep.subr.bf16.mxu1 %v742_v0  ;;  %v572_v23 = vpack.c.bf16 %v213_v22, %v212_v21  ;;  %v215_v25 = vld [vmem:[#allocation7 + $0x68] sm:$0xff]  ;;  %v216_v27 = vld [vmem:[#allocation7 + $0x70] sm:$0xff]  ;;  %v217_v28 = vld [vmem:[#allocation7 + $0x78] sm:$0xff] }
  0x50   :  { %481 = vmatmul.mubr.msk.f32.vlgmr.msra.gmra.mrb[0].mxu0 %vm91_vm1, %v86_v5  ;;  %v575_v26 = vpack.c.bf16 %v215_v25, %v214_v24  ;;  %v578_v29 = vpack.c.bf16 %v217_v28, %v216_v27  ;;  %v89_v51 = vld [vmem:[%s905_s2] sm:$0x1]  ;;  %v326_v63 = vld [vmem:[#allocation8] sm:$0xff]  ;;  %v328_v3 = vld [vmem:[#allocation8 + $0x10] sm:$0xff] }
  0x51   :  { %550 = vmatprep.mubr.msk.f32.mxu0 %vm743_vm0, %v744_v1  ;;  %v90_v55 = vld [vmem:[%s906_s3] sm:$0x1]  ;;  %v329_v4 = vld [vmem:[#allocation8 + $0x18] sm:$0xff]  ;;  %v330_v6 = vld [vmem:[#allocation8 + $0x20] sm:$0xff] }
  0x52   :  { %561 = vmatpush3.bf16.msra.mxu1 %v560_v11  ;;  %v327_v1 = vld [vmem:[#allocation8 + $0x8] sm:$0xff]  ;;  %v584_v5 = vpack.c.bf16 %v329_v4, %v328_v3  ;;  %v332_v9 = vld [vmem:[#allocation8 + $0x30] sm:$0xff]  ;;  %v333_v10 = vld [vmem:[#allocation8 + $0x38] sm:$0xff] }
  0x53   :  { %562 = vmatprep.subr.bf16.mxu1 %v742_v0  ;;  %v581_v2 = vpack.c.bf16 %v327_v1, %v326_v63  ;;  %v331_v7 = vld [vmem:[#allocation8 + $0x28] sm:$0xff]  ;;  %v590_v11 = vpack.c.bf16 %v333_v10, %v332_v9  ;;  %v334_v12 = vld [vmem:[#allocation8 + $0x40] sm:$0xff]  ;;  %v336_v15 = vld [vmem:[#allocation8 + $0x50] sm:$0xff] }
  0x54   :  { %v587_v8 = vpack.c.bf16 %v331_v7, %v330_v6  ;;  %v335_v13 = vld [vmem:[#allocation8 + $0x48] sm:$0xff]  ;;  %v337_v16 = vld [vmem:[#allocation8 + $0x58] sm:$0xff]  ;;  %v338_v18 = vld [vmem:[#allocation8 + $0x60] sm:$0xff] }
  0x55   :  { %582 = vmatpush3.bf16.msra.mxu0 %v581_v2  ;;  %v339_v19 = vld [vmem:[#allocation8 + $0x68] sm:$0xff]  ;;  %v340_v21 = vld [vmem:[#allocation8 + $0x70] sm:$0xff]  ;;  %v341_v22 = vld [vmem:[#allocation8 + $0x78] sm:$0xff] }
  0x56   :  { %564 = vmatpush3.bf16.msra.mxu1 %v563_v14  ;;  %583 = vmatprep.subr.bf16.mxu0 %v742_v0  ;;  %v593_v14 = vpack.c.bf16 %v335_v13, %v334_v12 }
  0x57   :  { %565 = vmatprep.subr.bf16.mxu1 %v742_v0 }
  0x59   :  { %585 = vmatpush3.bf16.msra.mxu0 %v584_v5 }
  0x5a   :  { %567 = vmatpush3.bf16.msra.mxu1 %v566_v17  ;;  %586 = vmatprep.subr.bf16.mxu0 %v742_v0  ;;  %v596_v17 = vpack.c.bf16 %v337_v16, %v336_v15 }
  0x5b   :  { %568 = vmatprep.subr.bf16.mxu1 %v742_v0 }
  0x5d   :  { %588 = vmatpush3.bf16.msra.mxu0 %v587_v8 }
  0x5e   :  { %570 = vmatpush3.bf16.msra.mxu1 %v569_v20  ;;  %589 = vmatprep.subr.bf16.mxu0 %v742_v0  ;;  %v599_v20 = vpack.c.bf16 %v339_v19, %v338_v18 }
  0x5f   :  { %571 = vmatprep.subr.bf16.mxu1 %v742_v0 }
  0x61   :  { %591 = vmatpush3.bf16.msra.mxu0 %v590_v11 }
  0x62   :  { %573 = vmatpush3.bf16.msra.mxu1 %v572_v23  ;;  %592 = vmatprep.subr.bf16.mxu0 %v742_v0  ;;  %v602_v23 = vpack.c.bf16 %v341_v22, %v340_v21 }
  0x63   :  { %574 = vmatprep.subr.bf16.mxu1 %v742_v0 }
  0x65   :  { %594 = vmatpush3.bf16.msra.mxu0 %v593_v14 }
  0x66   :  { %576 = vmatpush3.bf16.msra.mxu1 %v575_v26  ;;  %595 = vmatprep.subr.bf16.mxu0 %v742_v0 }
  0x67   :  { %577 = vmatprep.subr.bf16.mxu1 %v742_v0 }
  0x69   :  { %597 = vmatpush3.bf16.msra.mxu0 %v596_v17 }
  0x6a   :  { %579 = vmatpush3.bf16.msra.mxu1 %v578_v29  ;;  %598 = vmatprep.subr.bf16.mxu0 %v742_v0 }
  0x6d   :  { %600 = vmatpush3.bf16.msra.mxu0 %v599_v20 }
  0x6e   :  { %601 = vmatprep.subr.bf16.mxu0 %v742_v0 }
  0x71   :  { %603 = vmatpush3.bf16.msra.mxu0 %v602_v23 }
 0x123   :  { %v161_v30 = vpop.f32.mrb[0].mxu0 }
 0x124   :  { %v165_v31 = vrot.slane %v161_v30, 4  ;;  %v482_v32 = vpop.f32.mrb[1].mxu0 }
 0x126   :  { %v166_v33 = vadd.f32 %v165_v31, %v161_v30 }
 0x128   :  { %v167_v34 = vrot.slane %v166_v33, 2 }
 0x12a   :  { %v168_v35 = vadd.f32 %v167_v34, %v166_v33 }
 0x12c   :  { %v169_v36 = vrot.slane %v168_v35, 1 }
 0x12e   :  { %v170_v37 = vadd.f32 %v169_v36, %v168_v35 }
 0x130   :  { %v172_v38 = vmul.f32 0.125, %v170_v37 }
 0x132   :  { %v173_v39 = vsub.f32 %v161_v30, %v172_v38 }
 0x134   :  { %v174_v40 = vmul.f32 %v173_v39, %v173_v39 }
 0x136   :  { %v175_v41 = vrot.slane %v174_v40, 4 }
 0x138   :  { %v176_v42 = vadd.f32 %v175_v41, %v174_v40 }
 0x13a   :  { %v177_v43 = vrot.slane %v176_v42, 2 }
 0x13c   :  { %v178_v44 = vadd.f32 %v177_v43, %v176_v42  ;;  %v218_v42 = vld [vmem:[%s908_s5] sm:$0x1]  ;;  %s745_s5 = smov [#allocation10]  }
 0x13d   :  { %s426_s22 = sshll.u32 %s745_s5, 4  ;;  %s427_s22 = int_to_ptr.vmem [resolvable:$true] %s426_s22 }
 0x13e   :  { %v179_v45 = vrot.slane %v178_v44, 1  ;;  %p711_p5 = scmp.lt.s32.totalorder %s427_s22, %s427_s22 }
 0x140   :  { %v180_v46 = vadd.f32 %v179_v45, %v178_v44  ;;  %v219_v45 = vld [vmem:[%s909_s6] sm:$0x1]  ;;  %s706_s6 = scalar_lea.vmem %s427_s22, 128 }
 0x141   :  { %p707_p4 = scmp.ne.s32.totalorder %s427_s22, %s706_s6  ;;  %p712_p6 = scmp.lt.s32.totalorder %s706_s6, %s706_s6 }
 0x142   :  { %v181_v47 = vmul.f32 0.125, %v180_v46 }
 0x143   :  { %p713_p7 = por %p712_p6, %p711_p5 }
 0x144   :  { %v182_v48 = vadd.f32 1e-05, %v181_v47 }
 0x145   :  { %p714_p8 = pnand %p713_p7, %p707_p4 }
 0x146   :  { %614 = vrsqrt.f32 %v182_v48 }
 0x150   :  { %v615_v53 = vpop.eup %614 }
 0x151   :  { %v184_v54 = vmul.f32 %v615_v53, %v89_v51 }
 0x153   :  { %v185_v56 = vmul.f32 %v184_v54, %v172_v38  ;;  %v191_v57 = vrot.slane %v184_v54, %v866_v52  ;;  %v438_v54 = vld [vmem:[%s911_s8] ss:$0 sm:$0xff] }
 0x155   :  { %v186_v58 = vsub.f32 %v90_v55, %v185_v56  ;;  %v193_v59 = vmul.f32 %v191_v57, %v161_v30 }
 0x157   :  { %v198_v60 = vrot.slane %v186_v58, %v866_v52 }
 0x159   :  { %v200_v61 = vadd.f32 %v198_v60, %v193_v59 }
 0x15b   :  { %v201_v62 = vmax.f32 %v200_v61, 0.0 }
 0x15d   :  { %516 = vmatmul.mubr.f32.vlgmr.msra.gmra.mrb[0].mxu1 %v201_v62 }
 0x230   :  { %v286_v24 = vpop.f32.mrb[0].mxu1 }
 0x231   :  { %v290_v25 = vrot.slane %v286_v24, 4  ;;  %v517_v26 = vpop.f32.mrb[1].mxu1 }
 0x233   :  { %v291_v27 = vadd.f32 %v290_v25, %v286_v24 }
 0x235   :  { %v292_v28 = vrot.slane %v291_v27, 2 }
 0x237   :  { %v293_v29 = vadd.f32 %v292_v28, %v291_v27 }
 0x239   :  { %v294_v30 = vrot.slane %v293_v29, 1 }
 0x23b   :  { %v295_v31 = vadd.f32 %v294_v30, %v293_v29 }
 0x23d   :  { %v296_v32 = vmul.f32 0.125, %v295_v31 }
 0x23f   :  { %v297_v33 = vsub.f32 %v286_v24, %v296_v32 }
 0x241   :  { %v298_v34 = vmul.f32 %v297_v33, %v297_v33 }
 0x243   :  { %v299_v35 = vrot.slane %v298_v34, 4 }
 0x245   :  { %v300_v36 = vadd.f32 %v299_v35, %v298_v34 }
 0x247   :  { %v301_v37 = vrot.slane %v300_v36, 2 }
 0x249   :  { %v302_v38 = vadd.f32 %v301_v37, %v300_v36 }
 0x24b   :  { %v303_v0 = vrot.slane %v302_v38, 1 }
 0x24d   :  { %v304_v39 = vadd.f32 %v303_v0, %v302_v38 }
 0x24f   :  { %v305_v40 = vmul.f32 0.125, %v304_v39 }
 0x251   :  { %v306_v41 = vadd.f32 1e-05, %v305_v40 }
 0x253   :  { %616 = vrsqrt.f32 %v306_v41 }
 0x25d   :  { %v617_v43 = vpop.eup %616 }
 0x25e   :  { %v308_v44 = vmul.f32 %v617_v43, %v218_v42 }
 0x260   :  { %v309_v46 = vmul.f32 %v308_v44, %v296_v32  ;;  %v315_v47 = vrot.slane %v308_v44, %v866_v52 }
 0x262   :  { %v310_v48 = vsub.f32 %v219_v45, %v309_v46  ;;  %v317_v49 = vmul.f32 %v315_v47, %v286_v24 }
 0x264   :  { %v322_v50 = vrot.slane %v310_v48, %v866_v52 }
 0x266   :  { %v324_v51 = vadd.f32 %v322_v50, %v317_v49 }
 0x268   :  { %v325_v53 = vmax.f32 %v324_v51, 0.0 }
 0x26a   :  { %551 = vmatmul.mubr.f32.vlgmr.msra.gmra.mrb[2].mxu0 %v325_v53 }
 0x33d   :  { %v415_v55 = vpop.f32.mrb[2].mxu0 }
 0x33e   :  { %v416_v56 = vadd.f32 %v438_v54, %v415_v55  ;;  %v552_v57 = vpop.f32.mrb[3].mxu0 }
 0x340   :  { %419 = vst [vmem:[#allocation10] sm:$0xff] %v416_v56 }
 0x341   :  { %717 = shalt.err (!%p714_p8)
}
 0x342   :  { %s718_s0 = scalar_lea.hbm %s912_s9, 128 }
 0x343   :  { %p719_p9 = scmp.ne.s32.totalorder %s912_s9, %s718_s0  ;;  %p722_p10 = scmp.lt.u32.totalorder %s718_s0, %s912_s9 }
 0x345   :  { %p724_p11 = pnand %p722_p10, %p719_p9 }
 0x347   :  { %727 = shalt.err (!%p724_p11)
}
 0x348   :  { %429 = dma.vmem_to_hbm [thread:$0]  %s427_s22, 128, %s912_s9, [#allocation4]  }
 0x349   :  { %734 = dma.done.wait [#allocation4], 128  }
 0x34a   :  { %735 = vsyncadd [#allocation4], 4294967168 }
 0x34b   :  { %433 = vsyncpa [#allocation3], 1 }
 0x34c   :  { %434 = vsyncpa [#allocation6], 1 }
 0x34d   :  { %435 = vsyncpa [#allocation9], 1 }
 0x34e   :  { %436 = vsyncpa [#allocation4], 1 }

</bundles_post_ra>
